<compile_context>
chip_gen: v6e
topology: v6e:2x2x1
jax: 0.10.0
libtpu: 0.0.40
codegen_flags: <defaults>
</compile_context>

<pallas_src>
import functools

import jax
import jax.numpy as jnp
from jax import lax
from jax.experimental import pallas as pl
from jax.experimental.pallas import tpu as pltpu

_VMEM_LIMIT = 32 * 1024 * 1024  # explicit scoped-VMEM budget, safe on v5e/v6e/v7x


def _pick_tile(dim, cap, align):
    """Largest tile <= cap that divides dim and is `align`-aligned (else full dim)."""
    if dim <= cap:
        return dim
    t = (cap // align) * align
    while t >= align:
        if dim % t == 0:
            return t
        t -= align
    return dim


# ----------------------------------------------------------------------------
# Kernel 1: tiled matmul  y = x @ w  (+ optional fused bias).
#   grid = (M//tm, N//tn, K//tk), f32 accumulator scratch, K axis last.
# ----------------------------------------------------------------------------
def _matmul_kernel(x_ref, w_ref, o_ref, acc_ref):
    @pl.when(pl.program_id(2) == 0)
    def _init():
        acc_ref[...] = jnp.zeros_like(acc_ref)

    acc_ref[...] += jnp.dot(x_ref[...], w_ref[...],
                            preferred_element_type=jnp.float32)

    @pl.when(pl.program_id(2) == pl.num_programs(2) - 1)
    def _store():
        o_ref[...] = acc_ref[...].astype(o_ref.dtype)


def _matmul_bias_kernel(x_ref, w_ref, b_ref, o_ref, acc_ref):
    @pl.when(pl.program_id(2) == 0)
    def _init():
        acc_ref[...] = jnp.zeros_like(acc_ref)

    acc_ref[...] += jnp.dot(x_ref[...], w_ref[...],
                            preferred_element_type=jnp.float32)

    @pl.when(pl.program_id(2) == pl.num_programs(2) - 1)
    def _store():
        # bias fused into the matmul epilogue (VPU slack) -- no extra HBM pass.
        o_ref[...] = (acc_ref[...] + b_ref[...].astype(jnp.float32)).astype(o_ref.dtype)


def pallas_matmul(x2d, w, bias=None, *, out_dtype=None,
                  tm_cap=256, tn_cap=256, tk_cap=512):
    M, K = x2d.shape
    K2, Nout = w.shape
    assert K == K2
    out_dtype = out_dtype if out_dtype is not None else x2d.dtype

    tm = _pick_tile(M, tm_cap, 8)
    tn = _pick_tile(Nout, tn_cap, 128)
    tk = _pick_tile(K, tk_cap, 128)
    grid = (M // tm, Nout // tn, K // tk)

    x_spec = pl.BlockSpec((tm, tk), lambda i, j, k: (i, k))
    w_spec = pl.BlockSpec((tk, tn), lambda i, j, k: (k, j))
    o_spec = pl.BlockSpec((tm, tn), lambda i, j, k: (i, j))
    scratch = [pltpu.VMEM((tm, tn), jnp.float32)]
    cparams = pltpu.CompilerParams(
        dimension_semantics=("parallel", "parallel", "arbitrary"),
        vmem_limit_bytes=_VMEM_LIMIT)
    out_shape = jax.ShapeDtypeStruct((M, Nout), out_dtype)

    if bias is None:
        return pl.pallas_call(
            _matmul_kernel, out_shape=out_shape, grid=grid,
            in_specs=[x_spec, w_spec], out_specs=o_spec,
            scratch_shapes=scratch, compiler_params=cparams,
        )(x2d, w)

    b2d = bias.reshape(1, Nout).astype(jnp.float32)
    b_spec = pl.BlockSpec((1, tn), lambda i, j, k: (0, j))
    return pl.pallas_call(
        _matmul_bias_kernel, out_shape=out_shape, grid=grid,
        in_specs=[x_spec, w_spec, b_spec], out_specs=o_spec,
        scratch_shapes=scratch, compiler_params=cparams,
    )(x2d, w, b2d)


# ----------------------------------------------------------------------------
# Kernel 2: flash-style attention reading q/k/v straight out of the packed qkv
# tensor [B, N, 3*H*dh].  grid = (B, H, q tiles, kv tiles); the head split and
# the q/k/v split are both expressed as BlockSpec index_maps (block size dh on
# the last axis), so no JAX-level split/transpose is needed.  Output is written
# directly into a [B, N, H*dh] slab ('b h n d -> b n (h d)' also for free).
# ----------------------------------------------------------------------------
def _flash_attn_kernel(q_ref, k_ref, v_ref, o_ref, m_sc, l_sc, acc_sc, *, scale):
    ki = pl.program_id(3)

    @pl.when(ki == 0)
    def _init():
        m_sc[...] = jnp.full(m_sc.shape, -jnp.inf, m_sc.dtype)
        l_sc[...] = jnp.zeros_like(l_sc)
        acc_sc[...] = jnp.zeros_like(acc_sc)

    q = q_ref[0] * scale            # (tq, dh)  -- scale folded into q (tq*dh, not tq*tkv)
    k = k_ref[0]                    # (tkv, dh)
    v = v_ref[0]                    # (tkv, dh)

    # Contract the dh axis of both operands -- no transposed copy of k.
    s = lax.dot_general(q, k, (((1,), (1,)), ((), ())),
                        preferred_element_type=jnp.float32)      # (tq, tkv)

    m_prev = m_sc[...]
    m_new = jnp.maximum(m_prev, jnp.max(s, axis=-1, keepdims=True))
    alpha = jnp.exp(m_prev - m_new)
    p = jnp.exp(s - m_new)
    l_sc[...] = alpha * l_sc[...] + jnp.sum(p, axis=-1, keepdims=True)
    acc_sc[...] = alpha * acc_sc[...] + jnp.dot(
        p.astype(v.dtype), v, preferred_element_type=jnp.float32)
    m_sc[...] = m_new

    @pl.when(ki == pl.num_programs(3) - 1)
    def _finalize():
        # normalization deferred to the (tq, dh) accumulator, not the (tq, tkv) tile.
        o_ref[0] = (acc_sc[...] / l_sc[...]).astype(o_ref.dtype)


def pallas_flash_attention(qkv, *, heads, dim_head, scale, tq_cap=512, tkv_cap=512):
    B, N, three_inner = qkv.shape
    H, dh = heads, dim_head
    assert three_inner == 3 * H * dh
    # dh is the last block dim on a packed last axis -> must be lane-aligned.
    assert dh % 128 == 0, "dim_head must be a multiple of 128 (module default is 128)"

    tq = _pick_tile(N, tq_cap, 8)
    tkv = _pick_tile(N, tkv_cap, 8)
    grid = (B, H, N // tq, N // tkv)

    # last-axis block index * dh picks out q / k / v for head h from packed qkv.
    q_spec = pl.BlockSpec((1, tq, dh), lambda b, h, qi, ki: (b, qi, h))
    k_spec = pl.BlockSpec((1, tkv, dh), lambda b, h, qi, ki: (b, ki, H + h))
    v_spec = pl.BlockSpec((1, tkv, dh), lambda b, h, qi, ki: (b, ki, 2 * H + h))
    o_spec = pl.BlockSpec((1, tq, dh), lambda b, h, qi, ki: (b, qi, h))

    return pl.pallas_call(
        functools.partial(_flash_attn_kernel, scale=scale),
        out_shape=jax.ShapeDtypeStruct((B, N, H * dh), qkv.dtype),
        grid=grid,
        in_specs=[q_spec, k_spec, v_spec],
        out_specs=o_spec,
        scratch_shapes=[pltpu.VMEM((tq, 1), jnp.float32),    # running max m
                        pltpu.VMEM((tq, 1), jnp.float32),    # running denom l
                        pltpu.VMEM((tq, dh), jnp.float32)],  # unnormalized acc
        compiler_params=pltpu.CompilerParams(
            dimension_semantics=("parallel", "parallel", "parallel", "arbitrary"),
            vmem_limit_bytes=_VMEM_LIMIT),
    )(qkv, qkv, qkv)


# ----------------------------------------------------------------------------
# Module wrapper
# ----------------------------------------------------------------------------
class AttentionPallas:
    def __init__(self, dim, heads=8, dim_head=128, dropout=0.1, *, key,
                 compute_dtype=jnp.float32):
        inner_dim = dim_head * heads
        self.heads = heads
        self.dim_head = dim_head
        self.dim = dim
        self.scale = dim_head ** (-0.5)
        self.project_out = not (heads == 1 and dim_head == dim)
        self.compute_dtype = compute_dtype

        k1, k2, k3 = jax.random.split(key, 3)
        # Deterministic synthetic parameters (shapes match the PyTorch module,
        # stored [in, out] so y = x @ W).
        self.w_qkv = jax.random.normal(k1, (dim, inner_dim * 3), jnp.float32) * 0.02
        if self.project_out:
            self.w_out = jax.random.normal(k2, (inner_dim, dim), jnp.float32) * 0.02
            self.b_out = jax.random.normal(k3, (dim,), jnp.float32) * 0.02
        else:
            self.w_out = None
            self.b_out = None

    def __call__(self, x):
        # x: [B, N, D]
        B, N, D = x.shape
        H, dh = self.heads, self.dim_head
        inner = H * dh
        cdt = self.compute_dtype

        # --- fused QKV projection (tiled Pallas matmul) ---
        qkv = pallas_matmul(x.reshape(B * N, D).astype(cdt),
                            self.w_qkv.astype(cdt), out_dtype=cdt)
        qkv = qkv.reshape(B, N, 3 * inner)            # free reshape, no transpose

        # --- flash attention; head split handled by BlockSpec index_maps ---
        out = pallas_flash_attention(qkv, heads=H, dim_head=dh, scale=self.scale)
        # out is already in 'b n (h d)' layout: [B, N, inner]

        # --- output projection with fused bias ---
        if self.project_out:
            y = pallas_matmul(out.reshape(B * N, inner), self.w_out.astype(cdt),
                              bias=self.b_out, out_dtype=jnp.float32)
            return y.reshape(B, N, self.dim)
        return out.astype(jnp.float32)


# ----------------------------------------------------------------------------
# Pure-JAX reference for the correctness check.
# ----------------------------------------------------------------------------
def reference_forward(mod: AttentionPallas, x):
    B, N, D = x.shape
    H, dh = mod.heads, mod.dim_head
    inner = H * dh
    qkv = x @ mod.w_qkv
    q, k, v = jnp.split(qkv, 3, axis=-1)
    q = q.reshape(B, N, H, dh).transpose(0, 2, 1, 3)
    k = k.reshape(B, N, H, dh).transpose(0, 2, 1, 3)
    v = v.reshape(B, N, H, dh).transpose(0, 2, 1, 3)
    dots = jnp.einsum("bhqd,bhkd->bhqk", q, k) * mod.scale
    attn = jax.nn.softmax(dots, axis=-1)
    out = jnp.einsum("bhqk,bhkd->bhqd", attn, v)
    out = out.transpose(0, 2, 1, 3).reshape(B, N, inner)
    if mod.project_out:
        out = out @ mod.w_out + mod.b_out
    return out


if __name__ == "__main__":
    # Small shapes consistent with the module: x is (batch, seq, dim).
    # dim_head=128 (the module default) keeps every per-head tile lane-dense.
    B, N, D = 2, 8, 32
    heads, dim_head = 2, 128

    key = jax.random.PRNGKey(0)
    kx, kp = jax.random.split(key)
    x = jax.random.normal(kx, (B, N, D), jnp.float32)

    mod = AttentionPallas(dim=D, heads=heads, dim_head=dim_head, key=kp)

    # f32 compute path: tight check against the pure-JAX reference.
    y = jax.block_until_ready(mod(x))
    y_ref = reference_forward(mod, x)
    assert y.shape == (B, N, D)
    assert jnp.allclose(y, y_ref, atol=1e-4, rtol=1e-4), "f32 mismatch vs reference"

    # bf16 compute path (v6e/v7x MXU-friendly intermediates, f32 accumulation).
    mod.compute_dtype = jnp.bfloat16
    y_bf16 = jax.block_until_ready(mod(x))
    assert jnp.allclose(y_bf16.astype(jnp.float32), y_ref, atol=2e-2, rtol=2e-2), \
        "bf16 mismatch vs reference"

    print("KERNEL_OK")
</pallas_src>

<mosaic_0001>
module attributes {stable_mosaic.version = 11 : i64} {
  func.func @_matmul_kernel(%arg0: i32, %arg1: i32, %arg2: i32, %arg3: memref<16x32xf32, #tpu.memory_space<vmem>>, %arg4: memref<32x256xf32, #tpu.memory_space<vmem>>, %arg5: memref<16x256xf32, #tpu.memory_space<vmem>>, %arg6: memref<16x256xf32, #tpu.memory_space<vmem>>) attributes {dimension_semantics = [#tpu.dimension_semantics<parallel>, #tpu.dimension_semantics<parallel>, #tpu.dimension_semantics<arbitrary>], iteration_bounds = array<i64: 1, 3, 1>, scalar_prefetch = 0 : i64, scratch_operands = 1 : i64, tpu.core_type = #tpu.core_type<tc>, window_params = [{transform_indices = @transform_0, window_bounds = array<i64: 16, 32>}, {transform_indices = @transform_1, window_bounds = array<i64: 32, 256>}, {transform_indices = @transform_2, window_bounds = array<i64: 16, 256>}]} {
    %c0_i32 = arith.constant 0 : i32
    %0 = arith.cmpi eq, %arg2, %c0_i32 : i32
    %1 = arith.extui %0 : i1 to i32
    %c0_i32_0 = arith.constant 0 : i32
    %2 = arith.cmpi ne, %1, %c0_i32_0 : i32
    scf.if %2 {
      %cst_10 = arith.constant 0.000000e+00 : f32
      %12 = vector.broadcast %cst_10 : f32 to vector<16x256xf32>
      %c0_11 = arith.constant 0 : index
      %c0_12 = arith.constant 0 : index
      %13 = vector.load %arg6[%c0_11, %c0_12] : memref<16x256xf32, #tpu.memory_space<vmem>>, vector<16x256xf32>
      tpu.vector_store %arg6[%c0_11, %c0_12], %12 {strides = array<i32>} : memref<16x256xf32, #tpu.memory_space<vmem>>, vector<16x256xf32>,
    } else {
    }
    %c0 = arith.constant 0 : index
    %c0_1 = arith.constant 0 : index
    %3 = vector.load %arg6[%c0, %c0_1] : memref<16x256xf32, #tpu.memory_space<vmem>>, vector<16x256xf32>
    %c0_2 = arith.constant 0 : index
    %c0_3 = arith.constant 0 : index
    %4 = vector.load %arg3[%c0_2, %c0_3] : memref<16x32xf32, #tpu.memory_space<vmem>>, vector<16x32xf32>
    %c0_4 = arith.constant 0 : index
    %c0_5 = arith.constant 0 : index
    %5 = vector.load %arg4[%c0_4, %c0_5] : memref<32x256xf32, #tpu.memory_space<vmem>>, vector<32x256xf32>
    %cst = arith.constant dense<0.000000e+00> : vector<16x256xf32>
    %6 = tpu.matmul %4, %5, %cst {dimension_numbers = #tpu.dot_dimension_numbers<[1], [0], [0], [1], [0, 0, 1, 1], [], []>} : vector<16x32xf32>, vector<32x256xf32>, vector<16x256xf32> -> vector<16x256xf32>
    %7 = arith.addf %3, %6 : vector<16x256xf32>
    %c0_6 = arith.constant 0 : index
    %c0_7 = arith.constant 0 : index
    %8 = vector.load %arg6[%c0_6, %c0_7] : memref<16x256xf32, #tpu.memory_space<vmem>>, vector<16x256xf32>
    tpu.vector_store %arg6[%c0_6, %c0_7], %7 {strides = array<i32>} : memref<16x256xf32, #tpu.memory_space<vmem>>, vector<16x256xf32>,
    %c0_i32_8 = arith.constant 0 : i32
    %9 = arith.cmpi eq, %arg2, %c0_i32_8 : i32
    %10 = arith.extui %9 : i1 to i32
    %c0_i32_9 = arith.constant 0 : i32
    %11 = arith.cmpi ne, %10, %c0_i32_9 : i32
    scf.if %11 {
      %c0_10 = arith.constant 0 : index
      %c0_11 = arith.constant 0 : index
      %12 = vector.load %arg6[%c0_10, %c0_11] : memref<16x256xf32, #tpu.memory_space<vmem>>, vector<16x256xf32>
      %c0_12 = arith.constant 0 : index
      %c0_13 = arith.constant 0 : index
      %13 = vector.load %arg5[%c0_12, %c0_13] : memref<16x256xf32, #tpu.memory_space<vmem>>, vector<16x256xf32>
      tpu.vector_store %arg5[%c0_12, %c0_13], %12 {strides = array<i32>} : memref<16x256xf32, #tpu.memory_space<vmem>>, vector<16x256xf32>,
    } else {
    }
    return
  }
  func.func @transform_0(%arg0: i32, %arg1: i32, %arg2: i32) -> (i32, i32) {
    %c0_i32 = arith.constant 0 : i32
    return %arg0, %arg2 : i32, i32
  }
  func.func @transform_1(%arg0: i32, %arg1: i32, %arg2: i32) -> (i32, i32) {
    %c0_i32 = arith.constant 0 : i32
    return %arg2, %arg1 : i32, i32
  }
  func.func @transform_2(%arg0: i32, %arg1: i32, %arg2: i32) -> (i32, i32) {
    %c0_i32 = arith.constant 0 : i32
    return %arg0, %arg1 : i32, i32
  }
}

</mosaic_0001>

<bundles_post_ra>
// kernel: tpu_custom_call.1
= control target key start
LH: loop header
LB: loop body
LE: loop exit
PB: predicated region body
PF: predicated region fallthrough
CT: control target
= control target key end

     0   :  { %7 = vsyncpa [#allocation4], 0  ;;  %s919_s0 = inlined_call_operand.hbm [shape: f32[16,32], index: 0, kind: input, shape index: {}]   ;;  %s920_s1 = inlined_call_operand.hbm [shape: f32[32,768], index: 1, kind: input, shape index: {}]   ;;  %s921_s2 = inlined_call_operand.hbm [shape: f32[16,768], index: 2, kind: output, shape index: {}]  }
   0x1   :  { %8 = vsyncpa [#allocation7], 0 }
   0x2   :  { %10 = vsyncpa [#allocation7 + $0x1], 0 }
   0x3   :  { %11 = vsyncpa [#allocation5], 0 }
   0x4   :  { %13 = vsyncpa [#allocation5 + $0x1], 0  ;;  %s745_s9 = smov 0   ;;  %s747_s10 = smov 0  }
   0x5   :  { %s749_s11 = smov 0   ;;  %s751_s12 = smov 0  }
   0x6   :  { %s753_s13 = smov 0   ;;  %s755_s14 = smov 0  }
   0x7 LB: > { %s467_s15 = sadd.s32 4294967295, %s716_s14   ;;  %s468_s16 = sadd.s32 4294967294, %s716_s14   ;;  %s716_s14 = sphi %s755_s14, %s19_s14   ;;  %s712_s13 = sphi %s753_s13, %s942_s13   ;;  %s708_s12 = sphi %s751_s12, %s941_s12   ;;  %s704_s11 = sphi %s749_s11, %s940_s11   ;;  %s700_s10 = sphi %s747_s10, %s939_s10   ;;  %s696_s9 = sphi %s745_s9, %s938_s9  }
   0x8   : > { %p82_p0 = scmp.ne.s32.totalorder %s704_s11, %s700_s10  ;;  %p83_p1 = scmp.eq.s32.totalorder %s716_s14, 0 }
   0x9   : > { %p88_p2 = scmp.ne.s32.totalorder %s700_s10, %s696_s9  ;;  %p782_p3 = scmp.eq.s32.totalorder %s467_s15, 0 }
   0xa   : > { %p786_p4 = por %p83_p1, %p82_p0  ;;  %p114_p5 = scmp.eq.s32.totalorder %s467_s15, 2 }
   0xb   : > { %p792_p6 = por %p782_p3, %p88_p2  ;;  %p120_p7 = scmp.eq.s32.totalorder %s468_s16, 2 }
   0xc   : > { %p796_p8 = por %p114_p5, %p82_p0  ;;  %p469_p9 = scmp.ge.s32.totalorder %s716_s14, 1 }
   0xd   : > { %s927_s19 = scalar_select %p792_p6, 1, 0 }
   0xe   : > { %s928_s20 = scalar_select %p796_p8, 1, 0 }
   0xf   : > { %p801_p10 = por %p120_p7, %p88_p2  ;;  %p127_p11 = scmp.lt.s32.totalorder %s716_s14, 4 }
  0x10   : > { %s718_s23 = smov [#allocation3]   ;;  %p517_p0 = scmp.lt.s32.totalorder %s716_s14, 3 }
  0x11   : > { %s929_s21 = scalar_select %p801_p10, 1, 0 }
  0x12   : > { %p806_p12 = pnand %p469_p9, %p127_p11  ;;  %s143_s24 = sshll.u32 %s718_s23, 4  ;;  %s144_s24 = int_to_ptr.vmem [resolvable:$true] %s143_s24 }
  0x13   : > { %930 = sst [smem:[#allocation12_spill]] %s929_s21  ;;  %p821_p2 = pnand %p517_p0, %p786_p4 }
  0x14   : > { %p504_p13 = pneg %p806_p12  ;;  %s34_s27 = sadd.s32 1, %s712_s13 }
  0x15   : > { %s589_s28 = scalar_lea.vmem %s144_s24, 256  ;;  %p597_p10 = scmp.lt.s32.totalorder %s144_s24, %s144_s24 }
  0x16   : > { %p815_p1 = pnand %p504_p13, %p782_p3  ;;  %p590_p7 = scmp.ne.s32.totalorder %s144_s24, %s589_s28 }
  0x17   : > { %p598_p8 = scmp.lt.s32.totalorder %s589_s28, %s589_s28 }
  0x18   : > { %p580_p5 = pneg %p815_p1 }
  0x19   : > { %p599_p6 = por %p598_p8, %p597_p10 }
  0x1a   : > { %p592_p9 = pnand %p590_p7, %p580_p5 }
  0x1c   : > { %p593_p11 = pneg %p592_p9 }
  0x1e   : > { %p600_p13 = pnand %p599_p6, %p593_p11 }
  0x20   : > { %603 = shalt.err (!%p600_p13)
}
  0x21   : > { %s719_s29 = smov 128   ;;  %s720_s30 = smov 8  }
  0x22   : > { %507 = dma.hbm_to_vmem [thread:$0]  (!%p815_p1), %s919_s0, 256, %s144_s24, [#allocation4], %s719_s29, %s719_s29, %s720_s30  }
  0x23   : > { %p36_p4 = scmp.ge.s32.totalorder %s34_s27, 3  ;;  %s75_s5 = sadd.s32 1, %s704_s11 }
  0x24   : > { %s157_s6 = sand.u32 1, %s704_s11   ;;  %s486_s15 = sshll.u32 %s712_s13, 8 }
  0x25   : > { %s944_s27 = smov (%p36_p4, %s34_s27), 0  ;;  %s472_s7 = sshll.u32 %s157_s6, 6 }
  0x26   : > { %s71_s8 = ssub.s32 %s712_s13, %s944_s27  ;;  %s170_s23 = scalar_lea.hbm %s920_s1, %s486_s15 }
  0x27   : > { %p73_p6 = scmp.eq.s32.totalorder %s71_s8, 0  ;;  %s161_s25 = scalar_lea.vmem [#allocation6], %s472_s7 }
  0x28   : > { %s171_s28 = sshll.u32 %s161_s25, 4  ;;  %s158_s24 = scalar_lea.sflag [#allocation7], %s157_s6  ;;  %s172_s28 = int_to_ptr.vmem [resolvable:$true] %s171_s28 }
  0x29   : > { %s844_s21 = scalar_select %p73_p6, %s704_s11, %s75_s5  }
  0x2a   : > { %p606_p8 = pneg %p821_p2  ;;  %s617_s29 = scalar_lea.vmem %s172_s28, 1024 }
  0x2b   : > { %p618_p10 = scmp.ne.s32.totalorder %s172_s28, %s617_s29  ;;  %s721_s30 = smov [#allocation6]  }
  0x2c   : > { %s622_s3 = sshll.u32 %s721_s30, 4  ;;  %s623_s3 = int_to_ptr.vmem [resolvable:$false] %s622_s3 }
  0x2d   : > { %p620_p0 = pnand %p618_p10, %p606_p8  ;;  %s624_s4 = scalar_lea.vmem %s623_s3, 2048 }
  0x2e   : > { %p625_p5 = scmp.lt.s32.totalorder %s172_s28, %s623_s3  ;;  %p626_p7 = scmp.lt.s32.totalorder %s624_s4, %s617_s29 }
  0x2f   : > { %p621_p1 = pneg %p620_p0 }
  0x30   : > { %p627_p9 = por %p626_p7, %p625_p5 }
  0x32   : > { %p628_p11 = pnand %p627_p9, %p621_p1 }
  0x34   : > { %631 = shalt.err (!%p628_p11)
}
  0x35   : > { %s722_s7 = smov 768   ;;  %s723_s5 = smov 256  }
  0x36   : > { %s724_s8 = smov 16   ;;  %183 = sbr.rel (%p806_p12) target bundleno = 284 (0x11c), region = 28 }
  0x37   : > { %511 = dma.hbm_to_vmem [thread:$0]  (!%p821_p2), %s170_s23, 1024, %s172_s28, %s158_s24, %s722_s7, %s723_s5, %s724_s8  }
  0x3b   : > { %683 = dma.done.wait (%p782_p3), [#allocation4], 256  }
  0x3c   : > { %685 = vsyncadd (%p782_p3), [#allocation4], 4294967040  ;;  %s857_s6 = sand.u32 1, %s700_s10   ;;  %p934_p13 = scmp.ne.s32.totalorder %s927_s19, 0 }
  0x3d   : > { %s477_s15 = sshll.u32 %s857_s6, 6  ;;  %s190_s16 = scalar_lea.sflag [#allocation7], %s857_s6 }
  0x3e   : > { %s193_s18 = scalar_lea.vmem [#allocation6], %s477_s15 }
  0x3f   : > { %687 = dma.done.wait (%p934_p13), %s190_s16, 1024  }
  0x40   : > { %689 = vsyncadd (%p934_p13), %s190_s16, 4294966272  ;;  %v725_v0 = vmov 0.0   ;;  %v240_v1 = vld [vmem:[%s193_s18 + $0x38] sm:$0xff]  ;;  %v239_v2 = vld [vmem:[%s193_s18 + $0x30] sm:$0xff]  ;;  %vm241_vm0 = vcmask 261120   ;;  %s478_s17 = sshll.u32 %s857_s6, 5 }
  0x41   : > { %312 = vmatprep.mubr.f32.mxu0 %v725_v0  ;;  %318 = vmatprep.mubr.f32.mxu1 %v725_v0  ;;  %v238_v3 = vld [vmem:[%s193_s18 + $0x28] sm:$0xff]  ;;  %v237_v4 = vld [vmem:[%s193_s18 + $0x20] sm:$0xff]  ;;  %v236_v5 = vld [vmem:[%s193_s18 + $0x18] sm:$0xff]  ;;  %s213_s19 = scalar_lea.vmem [#allocation8], %s478_s17  ;;  %s487_s26 = sshll.u32 %s708_s12, 8 }
  0x42   : > { %272 = vmatprep.subr.mxu0 %v240_v1  ;;  %488 = vmatprep.subr.mxu1 %v240_v1  ;;  %v235_v6 = vld [vmem:[%s193_s18 + $0x10] sm:$0xff]  ;;  %v234_v7 = vld [vmem:[%s193_s18 + $0x8] sm:$0xff]  ;;  %v233_v8 = vld [vmem:[%s193_s18] sm:$0xff]  ;;  %s361_s22 = sshll.u32 %s213_s19, 4  ;;  %s872_s28 = scalar_lea.hbm %s921_s2, %s487_s26  ;;  %s867_s22 = int_to_ptr.vmem [resolvable:$true] %s361_s22 }
  0x43   : > { %273 = vmatpush1.msra.mxu0 %v239_v2  ;;  %492 = vmatpush1.msra.mxu1 %v239_v2  ;;  %v231_v9 = vld [vmem:[#allocation3] sm:$0xff]  ;;  %v232_v10 = vld [vmem:[#allocation3 + $0x8] sm:$0xff]  ;;  %s345_s24 = scalar_lea.sflag [#allocation5], %s857_s6  ;;  %s632_s12 = scalar_lea.vmem %s867_s22, 512 }
  0x44   : > { %274 = vmatprep.subr.mxu0 %v238_v3  ;;  %489 = vmatprep.subr.mxu1 %v238_v3  ;;  %p633_p3 = scmp.ne.s32.totalorder %s867_s22, %s632_s12  ;;  %p935_p12 = scmp.ne.s32.totalorder %s928_s20, 0 }
  0x45   : > { %275 = vmatpush1.msra.mxu0 %v237_v4  ;;  %493 = vmatpush1.msra.mxu1 %v237_v4  ;;  %s726_s29 = smov [#allocation8]  }
  0x46   : > { %276 = vmatprep.subr.mxu0 %v236_v5  ;;  %490 = vmatprep.subr.mxu1 %v236_v5  ;;  %p634_p2 = pnand %p633_p3, %p935_p12  ;;  %s636_s30 = sshll.u32 %s726_s29, 4  ;;  %s637_s30 = int_to_ptr.vmem [resolvable:$false] %s636_s30 }
  0x47   : > { %277 = vmatpush1.msra.mxu0 %v235_v6  ;;  %494 = vmatpush1.msra.mxu1 %v235_v6  ;;  %s638_s3 = scalar_lea.vmem %s637_s30, 1024  ;;  %p639_p6 = scmp.lt.s32.totalorder %s867_s22, %s637_s30 }
  0x48   : > { %278 = vmatprep.subr.mxu0 %v234_v7  ;;  %491 = vmatprep.subr.mxu1 %v234_v7  ;;  %p635_p4 = pneg %p634_p2  ;;  %p640_p8 = scmp.lt.s32.totalorder %s638_s3, %s632_s12 }
  0x49   : > { %279 = vmatpush1.msra.mxu0 %v233_v8  ;;  %495 = vmatpush1.msra.mxu1 %v233_v8 }
  0x4a   : > { %479 = vmatmul.mubr.msk.f32.vlgmr.msra.gmra.mxu0 %vm241_vm0, %v231_v9  ;;  %480 = vmatmul.mubr.msk.f32.vlgmr.msra.gmra.mxu1 %vm241_vm0, %v232_v10  ;;  %p641_p10 = por %p640_p8, %p639_p6 }
  0x4c   : > { %p642_p0 = pnand %p641_p10, %p635_p4 }
 0x10a   : > { %v314_v11 = vpop.f32.mrf.mxu0  ;;  %v320_v12 = vpop.f32.mrf.mxu1 }
 0x10b   : > { %340 = vst [vmem:[%s213_s19] sm:$0xff] %v314_v11  ;;  %342 = vst [vmem:[%s213_s19 + $0x10] sm:$0xff] %v320_v12 }
 0x10c   : > { %v316_v13 = vpop.f32.mrf.mxu0  ;;  %v322_v14 = vpop.f32.mrf.mxu1 }
 0x10d   : > { %341 = vst [vmem:[%s213_s19 + $0x8] sm:$0xff] %v316_v13  ;;  %343 = vst [vmem:[%s213_s19 + $0x18] sm:$0xff] %v322_v14 }
 0x10e   : > { %645 = shalt.err (!%p642_p0)
}
 0x10f   : > { %s646_s4 = scalar_lea.hbm %s872_s28, 512  ;;  %s650_s8 = scalar_lea.hbm %s921_s2, 1536 }
 0x110   : > { %p647_p1 = scmp.ne.s32.totalorder %s872_s28, %s646_s4  ;;  %p651_p9 = scmp.lt.s32.totalorder %s872_s28, %s921_s2 }
 0x111   : > { %p652_p11 = scmp.lt.s32.totalorder %s650_s8, %s646_s4 }
 0x112   : > { %p648_p5 = pnand %p647_p1, %p935_p12 }
 0x113   : > { %p653_p13 = por %p652_p11, %p651_p9 }
 0x114   : > { %p649_p7 = pneg %p648_p5 }
 0x116   : > { %p654_p3 = pnand %p653_p13, %p649_p7 }
 0x118   : > { %657 = shalt.err (!%p654_p3)
}
 0x119   : > { %s727_s18 = smov 256   ;;  %s728_s17 = smov 768  }
 0x11a   : > { %s729_s19 = smov 16  }
 0x11b   : > { %502 = dma.vmem_to_hbm [thread:$0]  (%p935_p12), %s867_s22, 512, %s872_s28, %s345_s24, %s727_s18, %s728_s17, %s729_s19  }
 0x11c PF: > { %s936_s26 = sld [smem:[#allocation12_spill]]  ;;  %p519_p2 = scmp.ge.s32.totalorder %s716_s14, 2 }
 0x11d   : > { %s376_s23 = sand.u32 1, %s696_s9  }
 0x11e   : > { %s377_s25 = scalar_lea.sflag [#allocation5], %s376_s23 }
 0x122   : > { %p937_p4 = scmp.ne.s32.totalorder %s936_s26, 0 }
 0x124   : > { %p513_p6 = pnand %p519_p2, %p937_p4 }
 0x126   : > { %p514_p8 = pneg %p513_p6 }
 0x128   : > { %691 = dma.done.wait (%p514_p8), %s377_s25, 512  }
 0x129   : > { %693 = vsyncadd (%p514_p8), %s377_s25, 4294966784  ;;  %s19_s14 = sadd.s32 1, %s716_s14   ;;  %s938_s9 = smov %s700_s10 }
 0x12a   : > { %p16_p10 = scmp.ge.s32.totalorder %s19_s14, 5   ;;  %s939_s10 = smov %s704_s11 }
 0x12b   : > { %s940_s11 = smov %s844_s21  ;;  %s941_s12 = smov %s712_s13 }
 0x12c   : > { %s942_s13 = smov %s944_s27  ;;  %18 = sbr.rel (!%p16_p10) target bundleno = 7 (0x7), region = 87 }
 0x131   :  { %382 = vsyncpa [#allocation4], 1 }
 0x132   :  { %384 = vsyncpa [#allocation4 + $0x1], 1 }
 0x133   :  { %385 = vsyncpa [#allocation7], 1 }
 0x134   :  { %387 = vsyncpa [#allocation7 + $0x1], 1 }
 0x135   :  { %388 = vsyncpa [#allocation5], 1 }
 0x136   :  { %390 = vsyncpa [#allocation5 + $0x1], 1 }

</bundles_post_ra>
